<compile_context>
chip_gen: v7x
topology: tpu7x:2x2x1
jax: 0.10.0
libtpu: 0.0.40
codegen_flags: <defaults>
</compile_context>

<pallas_src>
import jax
import jax.numpy as jnp
from jax.experimental import pallas as pl
from jax.experimental.pallas import tpu as pltpu

LANE = 128
MAX_TM = 16384                      # lane-tile ceiling
TILE_BUDGET = 32 * 1024 * 1024      # double-buffered tiles + f32 intermediates (bytes)
VMEM_LIMIT = 48 * 1024 * 1024       # raised scoped-VMEM limit; <= 48 MiB keeps headroom on v7x


def _round_up(a, b):
    return ((a + b - 1) // b) * b


def _cdiv(a, b):
    return (a + b - 1) // b


def _pick_tile(hw, c, cout, x_bytes, out_bytes, max_tm=None):
    """Largest lane tile (multiple of 128) whose double-buffered in/out tiles plus the
    f32 intermediates Mosaic materializes fit TILE_BUDGET."""
    per_lane = (2 * c * x_bytes            # x tile, double-buffered
                + 2 * cout * out_bytes     # out tile, double-buffered
                + 4 * (2 * c + cout))      # f32 intermediates (x up-cast, y, out acc)
    cap = max(LANE, TILE_BUDGET // max(per_lane, 1))
    tm = min(cap, _round_up(hw, LANE), max_tm or MAX_TM)
    return max(LANE, (tm // LANE) * LANE)


# -----------------------------------------------------------------------------
# Kernel 1: per-channel sum / sum-of-squares on the unpadded (N, C, HW) view.
# Channels on sublanes, H*W on lanes.  Ragged last tile masked before the lane
# reductions.  Per-(batch, hw-split) partial accumulators so the outer axes are
# "parallel" (keeps both v7x TensorCores busy even at N=1 with the hw split).
# -----------------------------------------------------------------------------
def _make_stats_kernel(C, tm, HW, n_inner, need_mask):
    def kernel(x_ref, sum_ref, sq_ref):
        i = pl.program_id(2)

        @pl.when(i == 0)
        def _():
            sum_ref[...] = jnp.zeros_like(sum_ref)
            sq_ref[...] = jnp.zeros_like(sq_ref)

        x = x_ref[...].astype(jnp.float32)                       # (C, tm)
        if need_mask:
            # Zero out-of-range lanes of the (only) ragged tile so they never reach
            # the reductions (OOB input lanes contain garbage).
            start = (pl.program_id(1) * n_inner + i) * tm
            lane = jax.lax.broadcasted_iota(jnp.int32, (C, tm), 1)
            x = jnp.where(lane < (HW - start), x, 0.0)
        sum_ref[...] += jnp.sum(x, axis=1, keepdims=True)        # (C, 1)
        sq_ref[...] += jnp.sum(x * x, axis=1, keepdims=True)     # (C, 1)
    return kernel


def _channel_stats(x3, tm, hw_outer):
    """x3: (N, C, HW) unpadded.  Returns partial (sum, sumsq), each (N*hw_outer, C, 1) f32."""
    N, C, HW = x3.shape
    n_tiles = _cdiv(HW, tm)
    n_inner = n_tiles // hw_outer        # hw_outer always divides n_tiles exactly (see wrapper)
    kernel = _make_stats_kernel(C, tm, HW, n_inner, need_mask=(HW % tm != 0))
    return pl.pallas_call(
        kernel,
        out_shape=(jax.ShapeDtypeStruct((N * hw_outer, C, 1), jnp.float32),
                   jax.ShapeDtypeStruct((N * hw_outer, C, 1), jnp.float32)),
        grid_spec=pltpu.PrefetchScalarGridSpec(
            num_scalar_prefetch=0,
            grid=(N, hw_outer, n_inner),
            in_specs=[pl.BlockSpec((None, C, tm),
                                   lambda n, o, i: (n, 0, o * n_inner + i))],
            out_specs=[pl.BlockSpec((None, C, 1),
                                    lambda n, o, i: (n * hw_outer + o, 0, 0)),
                       pl.BlockSpec((None, C, 1),
                                    lambda n, o, i: (n * hw_outer + o, 0, 0))],
        ),
        compiler_params=pltpu.CompilerParams(
            dimension_semantics=("parallel", "parallel", "arbitrary"),
            vmem_limit_bytes=VMEM_LIMIT),
    )(x3)


# -----------------------------------------------------------------------------
# Kernel 2: fused  (stat combine -> BN affine) -> ReLU -> 1x1 conv  per lane tile.
# The partial-stat combine and scale/shift live inside the kernel (tiny per-step
# cost: a few (C,1) vector ops + one rsqrt on the otherwise-idle EUP), so there
# is zero XLA glue between the two pallas_calls.  Lane-dense (Cout, tm) output.
# -----------------------------------------------------------------------------
def _make_fused_kernel(C, Cout, P, inv_count, eps, use_mxu):
    def kernel(x_ref, s_ref, sq_ref, g_ref, b_ref, w_ref, o_ref):
        # Combine the P = N*hw_outer partial statistics (explicit unrolled adds).
        s = s_ref[0]
        sq = sq_ref[0]
        for p in range(1, P):
            s = s + s_ref[p]
            sq = sq + sq_ref[p]
        mean = s * inv_count                                     # (C, 1)
        # E[x^2] - E[x]^2 in f32 with a clamp; can drift from PyTorch's two-pass
        # variance for strongly non-centered data (known precision limitation).
        var = jnp.maximum(sq * inv_count - mean * mean, 0.0)
        inv = g_ref[...] * jax.lax.rsqrt(var + eps)              # rsqrt -> EUP slot
        shift = b_ref[...] - mean * inv

        x = x_ref[...].astype(jnp.float32)                       # (C, tm)
        y = jnp.maximum(x * inv + shift, 0.0)                    # BN affine + ReLU

        w = w_ref[...]                                           # (Cout, C), native dtype
        if use_mxu:
            if w.dtype == jnp.bfloat16:
                out = jnp.dot(w, y.astype(jnp.bfloat16),
                              preferred_element_type=jnp.float32)
            else:
                out = jnp.dot(w.astype(jnp.float32), y,
                              preferred_element_type=jnp.float32)
        else:
            # Tiny C: short VPU FMA chain on full-lane vregs beats a nearly-empty MXU tile.
            wf = w.astype(jnp.float32)
            out = wf[:, 0:1] * y[0:1, :]
            for c in range(1, C):
                out = out + wf[:, c:c + 1] * y[c:c + 1, :]
        o_ref[...] = out.astype(o_ref.dtype)
    return kernel


def _fused_bn_relu_conv(x3, s_part, sq_part, gamma2, beta2, w2, tm, eps, out_dtype):
    N, C, HW = x3.shape
    Cout = w2.shape[0]
    P = s_part.shape[0]
    n_tiles = _cdiv(HW, tm)
    inv_count = 1.0 / float(N * HW)
    kernel = _make_fused_kernel(C, Cout, P, inv_count, float(eps), use_mxu=(C > 8))
    return pl.pallas_call(
        kernel,
        out_shape=jax.ShapeDtypeStruct((N, Cout, HW), out_dtype),
        grid_spec=pltpu.PrefetchScalarGridSpec(
            num_scalar_prefetch=0,
            grid=(N, n_tiles),
            in_specs=[
                pl.BlockSpec((None, C, tm), lambda n, i: (n, 0, i)),
                pl.BlockSpec((P, C, 1), lambda n, i: (0, 0, 0)),
                pl.BlockSpec((P, C, 1), lambda n, i: (0, 0, 0)),
                pl.BlockSpec((C, 1), lambda n, i: (0, 0)),
                pl.BlockSpec((C, 1), lambda n, i: (0, 0)),
                pl.BlockSpec((Cout, C), lambda n, i: (0, 0)),
            ],
            out_specs=pl.BlockSpec((None, Cout, tm), lambda n, i: (n, 0, i)),
        ),
        compiler_params=pltpu.CompilerParams(
            dimension_semantics=("parallel", "parallel"),
            vmem_limit_bytes=VMEM_LIMIT),
    )(x3, s_part, sq_part, gamma2, beta2, w2)


# -----------------------------------------------------------------------------
# Wrapper reproducing Transition.forward (training-mode batch statistics).
# -----------------------------------------------------------------------------
def transition_forward(x_nchw, gamma, beta, conv_w, eps=1e-5, max_tm=None):
    """x_nchw: (N, C, H, W); gamma/beta: (C,); conv_w: (Cout, C, 1, 1)."""
    N, C, H, W = x_nchw.shape
    Cout = conv_w.shape[0]
    HW = H * W

    # NCHW already has channels-on-sublanes / spatial-on-lanes: flattening H*W is free.
    x3 = x_nchw.reshape(N, C, HW)

    itemsize = jnp.dtype(x_nchw.dtype).itemsize
    tm = _pick_tile(HW, C, Cout, itemsize, itemsize, max_tm)
    n_tiles = _cdiv(HW, tm)
    # v7x has 2 TensorCores: when N is odd, split the HW tiles 2-way "parallel" too.
    # Only an exact split is used so no grid block ever starts past the array.
    hw_outer = 2 if (N % 2 == 1 and n_tiles >= 2 and n_tiles % 2 == 0) else 1

    s_part, sq_part = _channel_stats(x3, tm, hw_outer)

    gamma2 = gamma.astype(jnp.float32).reshape(C, 1)
    beta2 = beta.astype(jnp.float32).reshape(C, 1)
    w2 = conv_w.reshape(Cout, C)          # 1x1 conv weight; kept in native dtype (bf16 stays bf16)

    out3 = _fused_bn_relu_conv(x3, s_part, sq_part, gamma2, beta2, w2, tm, eps, x_nchw.dtype)
    # TODO(synk): PyTorch training-mode BatchNorm also updates running_mean/running_var
    # buffers; this forward only produces the output tensor.
    return out3.reshape(N, Cout, H, W)


# Pure-JAX reference for sanity checks
def _reference(x, gamma, beta, conv_w, eps=1e-5):
    x = x.astype(jnp.float32)
    w = conv_w.astype(jnp.float32)
    mean = jnp.mean(x, axis=(0, 2, 3), keepdims=True)
    var = jnp.var(x, axis=(0, 2, 3), keepdims=True)
    xn = (x - mean) / jnp.sqrt(var + eps)
    xn = xn * gamma.astype(jnp.float32).reshape(1, -1, 1, 1) \
        + beta.astype(jnp.float32).reshape(1, -1, 1, 1)
    xn = jnp.maximum(xn, 0.0)
    return jnp.einsum("nchw,oc->nohw", xn, w[:, :, 0, 0])


if __name__ == "__main__":
    key = jax.random.PRNGKey(0)
    k = jax.random.split(key, 8)

    def check(x, gamma, beta, w, atol, rtol, **kw):
        out = jax.block_until_ready(transition_forward(x, gamma, beta, w, **kw))
        ref = _reference(x, gamma, beta, w)
        assert out.shape == ref.shape
        diff = jnp.max(jnp.abs(out.astype(jnp.float32) - ref))
        assert jnp.allclose(out.astype(jnp.float32), ref, atol=atol, rtol=rtol), float(diff)

    # 1) Small-C VPU path, lane-aligned spatial.
    N, C, H, W, Cout = 2, 4, 16, 16, 8
    x = jax.random.normal(k[0], (N, C, H, W), dtype=jnp.float32)
    gamma = jax.random.uniform(k[1], (C,), minval=0.5, maxval=1.5)
    beta = jax.random.normal(k[2], (C,)) * 0.1
    w = jax.random.normal(k[3], (Cout, C, 1, 1)) * 0.5
    check(x, gamma, beta, w, 1e-4, 1e-4)

    # 2) Ragged spatial (7x7 = 49 lanes): masked stats tile, no pad/slice passes.
    x2 = jax.random.normal(k[4], (N, C, 7, 7), dtype=jnp.float32)
    check(x2, gamma, beta, w, 1e-4, 1e-4)

    # 3) MXU path, N=1 with exact 2-way HW "parallel" split (v7x core balance).
    C3, Cout3 = 16, 8
    x3 = jax.random.normal(k[5], (1, C3, 16, 16), dtype=jnp.float32)
    g3 = jax.random.uniform(k[6], (C3,), minval=0.5, maxval=1.5)
    b3 = jax.random.normal(k[7], (C3,)) * 0.1
    w3 = jax.random.normal(k[3], (Cout3, C3, 1, 1)) * 0.3
    check(x3, g3, b3, w3, 1e-4, 1e-4, max_tm=128)

    # 4) Multi-tile accumulation with ragged last tile (17x17 = 289 lanes -> 3 tiles).
    x4 = jax.random.normal(k[4], (1, C3, 17, 17), dtype=jnp.float32)
    check(x4, g3, b3, w3, 1e-4, 1e-4, max_tm=128)

    # 5) bf16 activations + weights: bf16 MXU operands, f32 accumulation.
    check(x3.astype(jnp.bfloat16), g3, b3, w3.astype(jnp.bfloat16), 2e-1, 5e-2)

    print("KERNEL_OK")
</pallas_src>

<mosaic_0001>
module attributes {stable_mosaic.version = 11 : i64} {
  func.func @kernel(%arg0: i32, %arg1: i32, %arg2: i32, %arg3: memref<1x4x256xf32, #tpu.memory_space<vmem>>, %arg4: memref<1x4x1xf32, #tpu.memory_space<vmem>>, %arg5: memref<1x4x1xf32, #tpu.memory_space<vmem>>) attributes {dimension_semantics = [#tpu.dimension_semantics<parallel>, #tpu.dimension_semantics<parallel>, #tpu.dimension_semantics<arbitrary>], iteration_bounds = array<i64: 2, 1, 1>, scalar_prefetch = 0 : i64, scratch_operands = 0 : i64, tpu.core_type = #tpu.core_type<tc>, window_params = [{transform_indices = @transform_0, window_bounds = array<i64: 1, 4, 256>}, {transform_indices = @transform_1, window_bounds = array<i64: 1, 4, 1>}, {transform_indices = @transform_2, window_bounds = array<i64: 1, 4, 1>}]} {
    %c0_i32 = arith.constant 0 : i32
    %0 = arith.cmpi eq, %arg2, %c0_i32 : i32
    %1 = arith.extui %0 : i1 to i32
    %c0_i32_0 = arith.constant 0 : i32
    %2 = arith.cmpi ne, %1, %c0_i32_0 : i32
    scf.if %2 {
      %cst_16 = arith.constant 0.000000e+00 : f32
      %22 = vector.broadcast %cst_16 : f32 to vector<4x1xf32>
      %c0_17 = arith.constant 0 : index
      %c0_18 = arith.constant 0 : index
      %c0_19 = arith.constant 0 : index
      %23 = vector.load %arg4[%c0_17, %c0_18, %c0_19] : memref<1x4x1xf32, #tpu.memory_space<vmem>>, vector<1x4x1xf32>
      %24 = vector.shape_cast %23 : vector<1x4x1xf32> to vector<4x1xf32>
      %25 = vector.shape_cast %22 : vector<4x1xf32> to vector<1x4x1xf32>
      tpu.vector_store %arg4[%c0_17, %c0_18, %c0_19], %25 {strides = array<i32>} : memref<1x4x1xf32, #tpu.memory_space<vmem>>, vector<1x4x1xf32>,
      %cst_20 = arith.constant 0.000000e+00 : f32
      %26 = vector.broadcast %cst_20 : f32 to vector<4x1xf32>
      %c0_21 = arith.constant 0 : index
      %c0_22 = arith.constant 0 : index
      %c0_23 = arith.constant 0 : index
      %27 = vector.load %arg5[%c0_21, %c0_22, %c0_23] : memref<1x4x1xf32, #tpu.memory_space<vmem>>, vector<1x4x1xf32>
      %28 = vector.shape_cast %27 : vector<1x4x1xf32> to vector<4x1xf32>
      %29 = vector.shape_cast %26 : vector<4x1xf32> to vector<1x4x1xf32>
      tpu.vector_store %arg5[%c0_21, %c0_22, %c0_23], %29 {strides = array<i32>} : memref<1x4x1xf32, #tpu.memory_space<vmem>>, vector<1x4x1xf32>,
    } else {
    }
    %c0 = arith.constant 0 : index
    %c0_1 = arith.constant 0 : index
    %c0_2 = arith.constant 0 : index
    %3 = vector.load %arg3[%c0, %c0_1, %c0_2] : memref<1x4x256xf32, #tpu.memory_space<vmem>>, vector<1x4x256xf32>
    %4 = vector.shape_cast %3 : vector<1x4x256xf32> to vector<4x256xf32>
    %c0_3 = arith.constant 0 : index
    %c0_4 = arith.constant 0 : index
    %c0_5 = arith.constant 0 : index
    %5 = vector.load %arg4[%c0_3, %c0_4, %c0_5] : memref<1x4x1xf32, #tpu.memory_space<vmem>>, vector<1x4x1xf32>
    %6 = vector.shape_cast %5 : vector<1x4x1xf32> to vector<4x1xf32>
    %cst = arith.constant dense<0.000000e+00> : vector<4xf32>
    %7 = vector.multi_reduction <add>, %4, %cst [1] : vector<4x256xf32> to vector<4xf32>
    %8 = vector.shape_cast %7 : vector<4xf32> to vector<4x1xf32>
    %9 = arith.addf %6, %8 : vector<4x1xf32>
    %c0_6 = arith.constant 0 : index
    %c0_7 = arith.constant 0 : index
    %c0_8 = arith.constant 0 : index
    %10 = vector.load %arg4[%c0_6, %c0_7, %c0_8] : memref<1x4x1xf32, #tpu.memory_space<vmem>>, vector<1x4x1xf32>
    %11 = vector.shape_cast %10 : vector<1x4x1xf32> to vector<4x1xf32>
    %12 = vector.shape_cast %9 : vector<4x1xf32> to vector<1x4x1xf32>
    tpu.vector_store %arg4[%c0_6, %c0_7, %c0_8], %12 {strides = array<i32>} : memref<1x4x1xf32, #tpu.memory_space<vmem>>, vector<1x4x1xf32>,
    %c0_9 = arith.constant 0 : index
    %c0_10 = arith.constant 0 : index
    %c0_11 = arith.constant 0 : index
    %13 = vector.load %arg5[%c0_9, %c0_10, %c0_11] : memref<1x4x1xf32, #tpu.memory_space<vmem>>, vector<1x4x1xf32>
    %14 = vector.shape_cast %13 : vector<1x4x1xf32> to vector<4x1xf32>
    %15 = arith.mulf %4, %4 : vector<4x256xf32>
    %cst_12 = arith.constant dense<0.000000e+00> : vector<4xf32>
    %16 = vector.multi_reduction <add>, %15, %cst_12 [1] : vector<4x256xf32> to vector<4xf32>
    %17 = vector.shape_cast %16 : vector<4xf32> to vector<4x1xf32>
    %18 = arith.addf %14, %17 : vector<4x1xf32>
    %c0_13 = arith.constant 0 : index
    %c0_14 = arith.constant 0 : index
    %c0_15 = arith.constant 0 : index
    %19 = vector.load %arg5[%c0_13, %c0_14, %c0_15] : memref<1x4x1xf32, #tpu.memory_space<vmem>>, vector<1x4x1xf32>
    %20 = vector.shape_cast %19 : vector<1x4x1xf32> to vector<4x1xf32>
    %21 = vector.shape_cast %18 : vector<4x1xf32> to vector<1x4x1xf32>
    tpu.vector_store %arg5[%c0_13, %c0_14, %c0_15], %21 {strides = array<i32>} : memref<1x4x1xf32, #tpu.memory_space<vmem>>, vector<1x4x1xf32>,
    return
  }
  func.func @transform_0(%arg0: i32, %arg1: i32, %arg2: i32) -> (i32, i32, i32) {
    %c1_i32 = arith.constant 1 : i32
    %0 = arith.muli %arg1, %c1_i32 : i32
    %1 = arith.addi %0, %arg2 : i32
    %c0_i32 = arith.constant 0 : i32
    %c0_i32_0 = arith.constant 0 : i32
    return %arg0, %c0_i32, %1 : i32, i32, i32
  }
  func.func @transform_1(%arg0: i32, %arg1: i32, %arg2: i32) -> (i32, i32, i32) {
    %c1_i32 = arith.constant 1 : i32
    %0 = arith.muli %arg0, %c1_i32 : i32
    %1 = arith.addi %0, %arg1 : i32
    %c0_i32 = arith.constant 0 : i32
    %c0_i32_0 = arith.constant 0 : i32
    %c0_i32_1 = arith.constant 0 : i32
    return %1, %c0_i32, %c0_i32_0 : i32, i32, i32
  }
  func.func @transform_2(%arg0: i32, %arg1: i32, %arg2: i32) -> (i32, i32, i32) {
    %c1_i32 = arith.constant 1 : i32
    %0 = arith.muli %arg0, %c1_i32 : i32
    %1 = arith.addi %0, %arg1 : i32
    %c0_i32 = arith.constant 0 : i32
    %c0_i32_0 = arith.constant 0 : i32
    %c0_i32_1 = arith.constant 0 : i32
    return %1, %c0_i32, %c0_i32_0 : i32, i32, i32
  }
}

</mosaic_0001>

<bundles_post_ra>
// kernel: tpu_custom_call.1
= control target key start
LH: loop header
LB: loop body
LE: loop exit
PB: predicated region body
PF: predicated region fallthrough
CT: control target
= control target key end

     0   :  { %8 = vsyncpa [#allocation3], 0  ;;  %s661_s0 = inlined_call_operand.hbm [shape: f32[2,4,256], index: 0, kind: input, shape index: {}]   ;;  %s662_s1 = inlined_call_operand.vmem [shape: f32[2,4,1], index: 1, kind: output, shape index: {0}]   ;;  %s663_s2 = inlined_call_operand.vmem [shape: f32[2,4,1], index: 2, kind: output, shape index: {1}]  }
   0x1   :  { %10 = vsyncpa [#allocation3 + $0x1], 0  ;;  %s529_s9 = smov 0   ;;  %s531_s10 = smov 0  }
   0x2   :  { %s533_s11 = smov 0   ;;  %s535_s12 = smov 0  }
   0x3   :  { %s537_s13 = smov 0   ;;  %s539_s14 = smov 0  }
   0x4 LB: > { %s359_s15 = sadd.s32 4294967295, %s510_s14   ;;  %s35_s16 = sadd.s32 1, %s506_s13  ;;  %s510_s14 = sphi %s539_s14, %s16_s14   ;;  %s506_s13 = sphi %s537_s13, %s673_s13   ;;  %s502_s12 = sphi %s535_s12, %s672_s12   ;;  %s498_s11 = sphi %s533_s11, %s671_s11   ;;  %s494_s10 = sphi %s531_s10, %s670_s10   ;;  %s490_s9 = sphi %s529_s9, %s669_s9  }
   0x5   : > { %p37_p0 = scmp.ge.s32.totalorder %s35_s16, 2  ;;  %s46_s17 = sadd.s32 1, %s498_s11 }
   0x6   : > { %p53_p1 = scmp.ne.s32.totalorder %s498_s11, %s494_s10  ;;  %p54_p2 = scmp.eq.s32.totalorder %s510_s14, 0 }
   0x7   : > { %s675_s16 = smov (%p37_p0, %s35_s16), 0  ;;  %p59_p4 = scmp.ne.s32.totalorder %s494_s10, %s490_s9 }
   0x8   : > { %p565_p3 = por %p54_p2, %p53_p1  ;;  %s41_s19 = ssub.s32 %s506_s13, %s675_s16 }
   0x9   : > { %p60_p5 = scmp.eq.s32.totalorder %s359_s15, 0  ;;  %p44_p6 = scmp.eq.s32.totalorder %s41_s19, 0 }
   0xa   : > { %p379_p8 = scmp.lt.s32.totalorder %s510_s14, 2  ;;  %s139_s22 = sand.u32 1, %s498_s11  }
   0xb   : > { %p572_p7 = por %p60_p5, %p59_p4  ;;  %s372_s23 = sshll.u32 %s506_s13, 7 }
   0xc   : > { %s578_s21 = scalar_select %p44_p6, %s498_s11, %s46_s17  }
   0xd   : > { %s363_s24 = sshll.u32 %s139_s22, 3  ;;  %s585_s27 = scalar_lea.hbm %s661_s0, %s372_s23 }
   0xe   : > { %s143_s28 = scalar_lea.vmem [#allocation2], %s363_s24  ;;  %p589_p9 = pnand %p379_p8, %p565_p3 }
   0xf   : > { %s154_s29 = sshll.u32 %s143_s28, 4  ;;  %s140_s3 = scalar_lea.sflag [#allocation3], %s139_s22  ;;  %s593_s29 = int_to_ptr.vmem [resolvable:$true] %s154_s29 }
  0x10   : > { %s430_s4 = scalar_lea.hbm %s585_s27, 128  ;;  %p432_p13 = pneg %p589_p9 }
  0x11   : > { %p431_p12 = scmp.ne.s32.totalorder %s585_s27, %s430_s4  ;;  %s435_s7 = scalar_lea.hbm %s661_s0, 256 }
  0x12   : > { %p436_p2 = scmp.lt.u32.totalorder %s585_s27, %s661_s0  ;;  %p437_p3 = scmp.lt.u32.totalorder %s435_s7, %s430_s4 }
  0x13   : > { %p433_p0 = pnand %p432_p13, %p431_p12  ;;  %p439_p5 = scmp.lt.u32.totalorder %s430_s4, %s585_s27 }
  0x14   : > { %p438_p4 = por %p437_p3, %p436_p2 }
  0x15   : > { %p434_p1 = pneg %p433_p0 }
  0x16   : > { %p440_p6 = por %p439_p5, %p438_p4 }
  0x18   : > { %p441_p8 = pnand %p440_p6, %p434_p1 }
  0x1a   : > { %444 = shalt.err (!%p441_p8)
}
  0x1b   : > { %s445_s15 = scalar_lea.vmem %s593_s29, 128  ;;  %s512_s17 = smov [#allocation2]  }
  0x1c   : > { %p446_p12 = scmp.ne.s32.totalorder %s593_s29, %s445_s15  ;;  %s450_s18 = sshll.u32 %s512_s17, 4  ;;  %s451_s18 = int_to_ptr.vmem [resolvable:$false] %s450_s18 }
  0x1d   : > { %s452_s19 = scalar_lea.vmem %s451_s18, 256  ;;  %p453_p11 = scmp.lt.s32.totalorder %s593_s29, %s451_s18 }
  0x1e   : > { %p448_p0 = pnand %p446_p12, %p432_p13  ;;  %p454_p2 = scmp.lt.s32.totalorder %s452_s19, %s445_s15 }
  0x20   : > { %p449_p10 = pneg %p448_p0  ;;  %p455_p3 = por %p454_p2, %p453_p11 }
  0x22   : > { %p456_p4 = pnand %p455_p3, %p449_p10 }
  0x24   : > { %459 = shalt.err (!%p456_p4)
}
  0x25   : > { %378 = dma.hbm_to_vmem [thread:$0]  (!%p589_p9), %s585_s27, 128, %s593_s29, %s140_s3  }
  0x26   : > { %p667_p1 = scmp.lt.s32.totalorder %s510_s14, 3  ;;  %p668_p5 = scmp.ge.s32.totalorder %s510_s14, 1 }
  0x28   : > { %p160_p13 = pnand %p668_p5, %p667_p1 }
  0x29   : > { %s165_s22 = sand.u32 (!%p160_p13), 1, %s494_s10  }
  0x2a   : > { %163 = sbr.rel (%p160_p13) target bundleno = 205 (0xcd), region = 24  ;;  %s367_s23 = sshll.u32 (!%p160_p13), %s165_s22, 3 }
  0x2b   : > { %s166_s24 = scalar_lea.sflag (!%p160_p13), [#allocation3], %s165_s22  ;;  %s169_s25 = scalar_lea.vmem (!%p160_p13), [#allocation2], %s367_s23 }
  0x31   : > { %485 = dma.done.wait (%p572_p7), %s166_s24, 128  }
  0x32   : > { %487 = vsyncadd (%p572_p7), %s166_s24, 4294967168  ;;  %p198_p10 = scmp.lt.s32.totalorder %s502_s12, 1  ;;  %vm213_vm0 = vcmask 3072   ;;  %vm221_vm1 = vcmask 1043456   ;;  %v513_v0 = vmov 0.0   ;;  %v216_v1 = vld [vmem:[%s169_s25] sm:$0xff] }
  0x33   : > { %v219_v2 = vcombine.high %v216_v1, %v216_v1  ;;  %v222_v3 = vsel %vm221_vm1, %v216_v1, 0.0  ;;  %v231_v4 = vmul.f32 %v216_v1, %v216_v1 }
  0x34   : > { %s677_s12 = smov (!%p198_p10, %s502_s12), 1 }
  0x35   : > { %s368_s26 = sshll.u32 %s677_s12, 2  ;;  %v223_v5 = vsel %vm221_vm1, %v219_v2, 0.0  ;;  %v233_v6 = vcombine.high %v231_v4, %v231_v4  ;;  %v235_v7 = vsel %vm221_vm1, %v231_v4, 0.0 }
  0x36   : > { %s201_s29 = scalar_lea.vmem %s662_s1, %s368_s26  ;;  %v224_v8 = vadd.f32 %v223_v5, %v222_v3  ;;  %s207_s30 = scalar_lea.vmem %s663_s2, %s368_s26 }
  0x37   : > { %214 = vst.msk [vmem:[%s201_s29] sm:$0xf] %vm213_vm0, %v513_v0  ;;  %v236_v9 = vsel %vm221_vm1, %v233_v6, 0.0  ;;  %215 = vst.msk [vmem:[%s207_s30] sm:$0xf] %vm213_vm0, %v513_v0 }
  0x38   : > { %225 = vadd.xlane.f32.xlu0 %v224_v8  ;;  %v237_v10 = vadd.f32 %v236_v9, %v235_v7 }
  0x3c   : > { %238 = vadd.xlane.f32.xlu0 %v237_v10 }
  0x3e   : > { %v217_v11 = vld [vmem:[%s201_s29] sm:$0xf] }
  0x3f   : > { %v230_v14 = vld [vmem:[%s207_s30] sm:$0xf] }
  0xc5   : > { %v226_v12 = vpop.xlane.xlu0 %225 }
  0xc6   : > { %v227_v13 = vadd.f32 %v226_v12, %v217_v11 }
  0xc8   : > { %229 = vst.msk [vmem:[%s201_s29] sm:$0xf] %vm213_vm0, %v227_v13 }
  0xc9   : > { %v239_v15 = vpop.xlane.xlu0 %238 }
  0xca   : > { %v240_v16 = vadd.f32 %v239_v15, %v230_v14 }
  0xcc   : > { %241 = vst.msk [vmem:[%s207_s30] sm:$0xf] %vm213_vm0, %v240_v16 }
  0xcd PF: > { %s16_s14 = sadd.s32 1, %s510_s14   ;;  %s669_s9 = smov %s494_s10 }
  0xce   : > { %p13_p7 = scmp.ge.s32.totalorder %s16_s14, 4   ;;  %s670_s10 = smov %s498_s11 }
  0xcf   : > { %s671_s11 = smov %s578_s21  ;;  %s672_s12 = smov %s506_s13 }
  0xd0   : > { %s673_s13 = smov %s675_s16  ;;  %15 = sbr.rel (!%p13_p7) target bundleno = 4 (0x4), region = 80 }
  0xd7   :  { %281 = vsyncpa [#allocation3], 1 }
  0xd8   :  { %283 = vsyncpa [#allocation3 + $0x1], 1 }

</bundles_post_ra>
